<compile_context>
chip_gen: v5e
topology: v5e:2x2
jax: 0.10.0
libtpu: 0.0.40
codegen_flags: <defaults>
</compile_context>

<pallas_src>
import functools

import jax
import jax.numpy as jnp
from jax import lax
from jax.experimental import pallas as pl
from jax.experimental.pallas import tpu as pltpu


def _segment_kernel(params_ref, x_ref, o_ref):
    # params_ref: SMEM (C+1,) f32 = [w_eff_0 .. w_eff_{C-1}, b_eff]
    # x_ref     : VMEM (1, C, TS, 128) input tile (lane-dense spatial)
    # o_ref     : VMEM (1, TS, 128)    output tile (lane-dense spatial)
    c = x_ref.shape[1]

    # VPU weighted sum over the channel planes (BN already folded into weights).
    acc = x_ref[0, 0, :, :] * params_ref[0]
    for ch in range(1, c):
        acc = acc + x_ref[0, ch, :, :] * params_ref[ch]
    y = acc + params_ref[c]

    # LeakyReLU(negative_slope=0.02)
    o_ref[0, :, :] = jnp.where(y >= 0, y, jnp.float32(0.02) * y)


@functools.partial(jax.jit, static_argnames=("max_ts",))
def segment_forward(x_nchw, conv_w, bn_params, *, max_ts=2048):
    """Fused 1x1 conv (no bias) + eval-mode BatchNorm2d + LeakyReLU(0.02).

    x_nchw   : (N, C, H, W) float
    conv_w   : (1, C, 1, 1) float  (PyTorch Conv2d(C, 1, 1, bias=False).weight)
    bn_params: (4,) float = [gamma, beta, running_mean, running_var]
    """
    n, c, h, w = x_nchw.shape
    hw = h * w

    # ---- Fold BatchNorm into the conv weights (tiny scalar math, done once).
    eps = jnp.float32(1e-5)
    gamma = bn_params[0]
    beta = bn_params[1]
    mean = bn_params[2]
    var = bn_params[3]
    scale = gamma * lax.rsqrt(var + eps)
    w_eff = conv_w.reshape(c).astype(jnp.float32) * scale          # (C,)
    b_eff = beta - mean * scale                                     # scalar
    params = jnp.concatenate(
        [w_eff, jnp.reshape(b_eff, (1,))]).astype(jnp.float32)      # (C+1,)

    # ---- NCHW-native lane-dense view: (N, C, S, 128), S = ceil(H*W/128).
    x3 = x_nchw.reshape(n, c, hw).astype(jnp.float32)
    rem = (-hw) % 128
    if rem:  # static; no-op (and no copy) when H*W is already a multiple of 128
        x3 = jnp.pad(x3, ((0, 0), (0, 0), (0, rem)))
    hw_pad = hw + rem
    s = hw_pad // 128
    x4 = x3.reshape(n, c, s, 128)

    # Spatial tile: full extent when small, otherwise a large multiple-of-8 row
    # tile (~4 MiB of input per step -> double-buffered blocks stay well under
    # the default scoped-VMEM limit on v5e/v6e/v7x).
    ts = s if s <= max_ts else max_ts
    grid = (n, pl.cdiv(s, ts))

    out4 = pl.pallas_call(
        _segment_kernel,
        out_shape=jax.ShapeDtypeStruct((n, s, 128), jnp.float32),
        grid=grid,
        in_specs=[
            pl.BlockSpec(memory_space=pltpu.MemorySpace.SMEM),        # folded params
            pl.BlockSpec((1, c, ts, 128), lambda ni, si: (ni, 0, si, 0)),
        ],
        out_specs=pl.BlockSpec((1, ts, 128), lambda ni, si: (ni, si, 0)),
        compiler_params=pltpu.CompilerParams(
            dimension_semantics=("parallel", "parallel"),
        ),
    )(params, x4)

    # ---- Free reshapes back to NCHW (no transpose needed).
    out = out4.reshape(n, 1, hw_pad)[:, :, :hw].reshape(n, 1, h, w)
    return out


def _reference(x_nchw, conv_w, bn_params):
    """Pure-JAX reference of the PyTorch forward (eval-mode BN)."""
    gamma, beta, mean, var = bn_params
    conv = jnp.einsum("nchw,c->nhw", x_nchw, conv_w.reshape(-1))[:, None, :, :]
    y = (conv - mean) * (gamma * lax.rsqrt(var + jnp.float32(1e-5))) + beta
    return jnp.where(y >= 0, y, 0.02 * y)


if __name__ == "__main__":
    key = jax.random.PRNGKey(0)
    k_x, k_w, k_g, k_b, k_m, k_v = jax.random.split(key, 6)

    # Small shapes consistent with the module: Segment(in_channels=4, out_channels=1)
    N, C, H, W = 2, 4, 16, 16
    x = jax.random.normal(k_x, (N, C, H, W), dtype=jnp.float32)

    # Synthetic parameters (shapes from __init__):
    #   Conv2d(C, 1, kernel_size=1, bias=False) weight: (1, C, 1, 1)
    #   BatchNorm2d(1): gamma, beta, running_mean, running_var (each scalar)
    conv_w = jax.random.normal(k_w, (1, C, 1, 1), dtype=jnp.float32) * 0.1
    gamma = jax.random.normal(k_g, (), dtype=jnp.float32) * 0.1 + 1.0
    beta = jax.random.normal(k_b, (), dtype=jnp.float32) * 0.1
    mean = jax.random.normal(k_m, (), dtype=jnp.float32) * 0.1
    var = jnp.abs(jax.random.normal(k_v, (), dtype=jnp.float32)) * 0.1 + 0.9
    bn_params = jnp.stack([gamma, beta, mean, var]).astype(jnp.float32)

    out = segment_forward(x, conv_w, bn_params)
    out = jax.block_until_ready(out)

    ref = _reference(x, conv_w, bn_params)
    assert out.shape == (N, 1, H, W)
    assert jnp.allclose(out, ref, atol=1e-5, rtol=1e-5)

    print("KERNEL_OK")
</pallas_src>

<mosaic_0001>
module attributes {stable_mosaic.version = 11 : i64} {
  func.func @_segment_kernel(%arg0: i32, %arg1: i32, %arg2: memref<5xf32, #tpu.memory_space<smem>>, %arg3: memref<1x4x2x128xf32, #tpu.memory_space<vmem>>, %arg4: memref<1x2x128xf32, #tpu.memory_space<vmem>>) attributes {dimension_semantics = [#tpu.dimension_semantics<parallel>, #tpu.dimension_semantics<parallel>], iteration_bounds = array<i64: 2, 1>, scalar_prefetch = 0 : i64, scratch_operands = 0 : i64, tpu.core_type = #tpu.core_type<tc>, window_params = [{transform_indices = @transform_0, window_bounds = array<i64: 5>}, {transform_indices = @transform_1, window_bounds = array<i64: 1, 4, 2, 128>}, {transform_indices = @transform_2, window_bounds = array<i64: 1, 2, 128>}]} {
    %c0 = arith.constant 0 : index
    %c0_0 = arith.constant 0 : index
    %c0_1 = arith.constant 0 : index
    %c0_2 = arith.constant 0 : index
    %0 = vector.load %arg3[%c0, %c0_0, %c0_1, %c0_2] : memref<1x4x2x128xf32, #tpu.memory_space<vmem>>, vector<1x1x2x128xf32>
    %1 = vector.shape_cast %0 : vector<1x1x2x128xf32> to vector<2x128xf32>
    %c0_3 = arith.constant 0 : index
    %2 = memref.load %arg2[%c0_3] : memref<5xf32, #tpu.memory_space<smem>>
    %3 = vector.broadcast %2 : f32 to vector<2x128xf32>
    %4 = arith.mulf %1, %3 : vector<2x128xf32>
    %c0_4 = arith.constant 0 : index
    %c1 = arith.constant 1 : index
    %c0_5 = arith.constant 0 : index
    %c0_6 = arith.constant 0 : index
    %5 = vector.load %arg3[%c0_4, %c1, %c0_5, %c0_6] : memref<1x4x2x128xf32, #tpu.memory_space<vmem>>, vector<1x1x2x128xf32>
    %6 = vector.shape_cast %5 : vector<1x1x2x128xf32> to vector<2x128xf32>
    %c1_7 = arith.constant 1 : index
    %7 = memref.load %arg2[%c1_7] : memref<5xf32, #tpu.memory_space<smem>>
    %8 = vector.broadcast %7 : f32 to vector<2x128xf32>
    %9 = arith.mulf %6, %8 : vector<2x128xf32>
    %10 = arith.addf %4, %9 : vector<2x128xf32>
    %c0_8 = arith.constant 0 : index
    %c2 = arith.constant 2 : index
    %c0_9 = arith.constant 0 : index
    %c0_10 = arith.constant 0 : index
    %11 = vector.load %arg3[%c0_8, %c2, %c0_9, %c0_10] : memref<1x4x2x128xf32, #tpu.memory_space<vmem>>, vector<1x1x2x128xf32>
    %12 = vector.shape_cast %11 : vector<1x1x2x128xf32> to vector<2x128xf32>
    %c2_11 = arith.constant 2 : index
    %13 = memref.load %arg2[%c2_11] : memref<5xf32, #tpu.memory_space<smem>>
    %14 = vector.broadcast %13 : f32 to vector<2x128xf32>
    %15 = arith.mulf %12, %14 : vector<2x128xf32>
    %16 = arith.addf %10, %15 : vector<2x128xf32>
    %c0_12 = arith.constant 0 : index
    %c3 = arith.constant 3 : index
    %c0_13 = arith.constant 0 : index
    %c0_14 = arith.constant 0 : index
    %17 = vector.load %arg3[%c0_12, %c3, %c0_13, %c0_14] : memref<1x4x2x128xf32, #tpu.memory_space<vmem>>, vector<1x1x2x128xf32>
    %18 = vector.shape_cast %17 : vector<1x1x2x128xf32> to vector<2x128xf32>
    %c3_15 = arith.constant 3 : index
    %19 = memref.load %arg2[%c3_15] : memref<5xf32, #tpu.memory_space<smem>>
    %20 = vector.broadcast %19 : f32 to vector<2x128xf32>
    %21 = arith.mulf %18, %20 : vector<2x128xf32>
    %22 = arith.addf %16, %21 : vector<2x128xf32>
    %c4 = arith.constant 4 : index
    %23 = memref.load %arg2[%c4] : memref<5xf32, #tpu.memory_space<smem>>
    %24 = vector.broadcast %23 : f32 to vector<2x128xf32>
    %25 = arith.addf %22, %24 : vector<2x128xf32>
    %cst = arith.constant 0.000000e+00 : f32
    %26 = vector.broadcast %cst : f32 to vector<2x128xf32>
    %27 = arith.cmpf oge, %25, %26 : vector<2x128xf32>
    %cst_16 = arith.constant 2.000000e-02 : f32
    %28 = vector.broadcast %cst_16 : f32 to vector<2x128xf32>
    %29 = arith.mulf %28, %25 : vector<2x128xf32>
    %30 = arith.select %27, %25, %29 : vector<2x128xi1>, vector<2x128xf32>
    %c0_17 = arith.constant 0 : index
    %c0_18 = arith.constant 0 : index
    %c0_19 = arith.constant 0 : index
    %31 = vector.load %arg4[%c0_17, %c0_18, %c0_19] : memref<1x2x128xf32, #tpu.memory_space<vmem>>, vector<1x2x128xf32>
    %32 = vector.shape_cast %31 : vector<1x2x128xf32> to vector<2x128xf32>
    %33 = vector.shape_cast %30 : vector<2x128xf32> to vector<1x2x128xf32>
    tpu.vector_store %arg4[%c0_17, %c0_18, %c0_19], %33 {strides = array<i32>} : memref<1x2x128xf32, #tpu.memory_space<vmem>>, vector<1x2x128xf32>,
    return
  }
  func.func @transform_0(%arg0: i32, %arg1: i32) -> i32 {
    %c0_i32 = arith.constant 0 : i32
    %c0_i32_0 = arith.constant 0 : i32
    return %c0_i32 : i32
  }
  func.func @transform_1(%arg0: i32, %arg1: i32) -> (i32, i32, i32, i32) {
    %c0_i32 = arith.constant 0 : i32
    %c0_i32_0 = arith.constant 0 : i32
    %c0_i32_1 = arith.constant 0 : i32
    return %arg0, %c0_i32, %arg1, %c0_i32_0 : i32, i32, i32, i32
  }
  func.func @transform_2(%arg0: i32, %arg1: i32) -> (i32, i32, i32) {
    %c0_i32 = arith.constant 0 : i32
    %c0_i32_0 = arith.constant 0 : i32
    return %arg0, %arg1, %c0_i32 : i32, i32, i32
  }
}

</mosaic_0001>

<bundles_post_ra>
// kernel: segment_forward.1
= control target key start
LH: loop header
LB: loop body
LE: loop exit
PB: predicated region body
PF: predicated region fallthrough
CT: control target
= control target key end

     0   :  { %7 = vsyncpa [#allocation3], 0  ;;  %s420_s9 = smov 0   ;;  %s422_s10 = smov 0   ;;  %s457_s0 = inlined_call_operand.vmem [shape: f32[5], index: 0, kind: input, shape index: {}]   ;;  %s458_s1 = inlined_call_operand.vmem [shape: f32[2,4,2,128], index: 1, kind: input, shape index: {}]   ;;  %s459_s2 = inlined_call_operand.vmem [shape: f32[2,2,128], index: 2, kind: output, shape index: {}]  }
   0x1   :  { %s424_s11 = smov 0  }
   0x2 LB: > { %s306_s12 = sadd.s32 4294967295, %s402_s11   ;;  %s25_s13 = sadd.s32 1, %s398_s10  ;;  %s402_s11 = sphi %s424_s11, %s13_s11   ;;  %s398_s10 = sphi %s422_s10, %s461_s10   ;;  %s394_s9 = sphi %s420_s9, %s460_s9  }
   0x3   : > { %p27_p0 = scmp.ge.s32.totalorder %s25_s13, 2  ;;  %p308_p1 = scmp.ge.s32.totalorder %s402_s11, 1 }
   0x4   : > { %p107_p2 = scmp.lt.s32.totalorder %s402_s11, 3  ;;  %p334_p4 = scmp.eq.s32.totalorder %s306_s12, 0 }
   0x5   : > { %s463_s13 = smov (%p27_p0, %s25_s13), 0  ;;  %s119_s16 = sshll.u32 %s457_s0, 4  ;;  %s120_s16 = int_to_ptr.vmem [resolvable:$true] %s119_s16 }
   0x6   : > { %p108_p3 = pnand %p308_p1, %p107_p2  ;;  %s404_s17 = smov [#allocation2]  }
   0x8   : > { %p330_p5 = pneg %p108_p3  ;;  %143 = sbr.rel (%p108_p3) target bundleno = 38 (0x26), region = 28 }
   0xa   : > { %p331_p6 = pnand %p334_p4, %p330_p5 }
   0xc   : > { %333 = dma.vmem_to_smem (!%p331_p6), %s120_s16, 16, %s404_s17, [#allocation3]  }
   0xd   : > { %389 = dma.done.wait (%p334_p4), [#allocation3], 16  }
   0xe   : > { %391 = vsyncadd (%p334_p4), [#allocation3], 4294967280 }
   0xf   : > { %150 = sfence }
  0x10   : > { %p172_p7 = scmp.lt.s32.totalorder %s394_s9, 1  ;;  %s188_s18 = sld [smem:[#allocation2]] }
  0x11   : > { %s317_s19 = sld [smem:[#allocation2 + $0x1]] }
  0x12   : > { %s465_s9 = smov (!%p172_p7, %s394_s9), 1  ;;  %s319_s20 = sld [smem:[#allocation2 + $0x2]] }
  0x13   : > { %s325_s21 = sshll.u32 %s465_s9, 3  ;;  %s321_s25 = sld [smem:[#allocation2 + $0x3]] }
  0x14   : > { %s179_s24 = scalar_lea.vmem %s458_s1, %s325_s21  ;;  %s322_s26 = sld [smem:[#allocation2 + $0x4]] }
  0x15   : > { %v187_v0 = vld [vmem:[%s179_s24] sm:$0x3]  ;;  %v316_v2 = vld [vmem:[%s179_s24 + $0x2] sm:$0x3]  ;;  %v318_v5 = vld [vmem:[%s179_s24 + $0x4] sm:$0x3] }
  0x16   : > { %v189_v1 = vstv %s188_s18  ;;  %v320_v10 = vld [vmem:[%s179_s24 + $0x6] sm:$0x3]  ;;  %s315_s27 = sshll.u32 %s465_s9, 1 }
  0x17   : > { %v190_v3 = vmul.f32 %v189_v1, %v187_v0  ;;  %v194_v4 = vstv %s317_s19  ;;  %s186_s30 = scalar_lea.vmem %s459_s2, %s315_s27 }
  0x18   : > { %v195_v6 = vmul.f32 %v316_v2, %v194_v4  ;;  %v200_v7 = vstv %s319_s20 }
  0x19   : > { %v201_v9 = vmul.f32 %v318_v5, %v200_v7  ;;  %v206_v12 = vstv %s321_s25 }
  0x1a   : > { %v196_v8 = vadd.f32 %v195_v6, %v190_v3  ;;  %v207_v13 = vmul.f32 %v320_v10, %v206_v12  ;;  %v210_v14 = vstv %s322_s26 }
  0x1c   : > { %v202_v11 = vadd.f32 %v201_v9, %v196_v8 }
  0x1e   : > { %v208_v15 = vadd.f32 %v207_v13, %v202_v11 }
  0x20   : > { %v211_v16 = vadd.f32 %v210_v14, %v208_v15 }
  0x22   : > { %vm212_vm0 = vcmp.ge.f32.partialorder %v211_v16, 0.0  ;;  %v213_v17 = vmul.f32 0.02, %v211_v16 }
  0x24   : > { %v214_v18 = vsel %vm212_vm0, %v211_v16, %v213_v17 }
  0x25   : > { %215 = vst [vmem:[%s186_s30] sm:$0x3] %v214_v18 }
  0x26 PF: > { %s13_s11 = sadd.s32 1, %s402_s11   ;;  %s460_s9 = smov %s398_s10 }
  0x27   : > { %p10_p8 = scmp.ge.s32.totalorder %s13_s11, 4   ;;  %s461_s10 = smov %s463_s13 }
  0x29   :  { %12 = sbr.rel (!%p10_p8) target bundleno = 2 (0x2), region = 66 }
  0x2e   :  { %241 = vsyncpa [#allocation3], 1 }
  0x2f   :  { %243 = vsyncpa [#allocation3 + $0x1], 1 }

</bundles_post_ra>
